<compile_context>
chip_gen: v7x
topology: tpu7x:2x2x1
jax: 0.10.0
libtpu: 0.0.40
codegen_flags: <defaults>
</compile_context>

<pallas_src>
import functools

import jax
import jax.numpy as jnp
from jax import lax
from jax.experimental import pallas as pl
from jax.experimental.pallas import tpu as pltpu

_LANE = 128
_SUBLANE = 8

# Dtype-aware block budget: min(input-byte budget / itemsize, f32 budget / 4).
_INPUT_BYTE_BUDGET = 8 * 1024 * 1024     # input bytes per block
_F32_BYTE_BUDGET = 12 * 1024 * 1024      # f32-widened working set per block

# 48 MiB scoped VMEM: below v7x's 64 MiB physical, well inside v5e/v6e's 128.
_VMEM_LIMIT_BYTES = 48 * 1024 * 1024

# Lane-folding cap (small-spatial path): fold rows until width ~= 8 vregs.
_FOLD_WIDTH_CAP = 1024


def _round_up(x: int, m: int) -> int:
    return pl.cdiv(x, m) * m


def _block_elems(itemsize: int) -> int:
    return min(_INPUT_BYTE_BUDGET // itemsize, _F32_BYTE_BUDGET // 4)


def _split_rows(rows: int, cap: int):
    """Split rows into an even number of equal 8-aligned tiles (megacore balance)."""
    if rows <= cap:
        return rows, 1
    num = pl.cdiv(rows, cap)
    if num % 2:
        num += 1                      # two TensorCores -> keep the split even
    r_tile = _round_up(pl.cdiv(rows, num), _SUBLANE)
    return r_tile, pl.cdiv(rows, r_tile)


def _fold_group(rows: int, spatial: int) -> int:
    """Largest divisor of rows keeping the folded lane width <= the cap."""
    cap = min(rows, max(1, _FOLD_WIDTH_CAP // spatial))
    for g in range(cap, 1, -1):
        if rows % g == 0:
            return g
    return 1


# --------------------------------------------------------------------------
# Streaming path: rows x spatial slab, reduction over the lane axis.
# --------------------------------------------------------------------------
def _sum_pool_kernel(x_ref, o_ref, acc_ref, *, pool_type, s_tile, spatial,
                     num_full, steps_per_shard, sharded):
    """Accumulates f32 row sums of f(x) over the spatial (lane) axis."""
    k = pl.program_id(1)

    @pl.when(k == 0)
    def _init():
        acc_ref[...] = jnp.zeros_like(acc_ref)

    # Logical spatial block handled this step.  For the sharded split the
    # index_map clamps overflow blocks' DMA; they are fully masked below.
    blk = pl.program_id(0) * steps_per_shard + k if sharded else k

    def _row_sum(vals):
        if pool_type == "rms":
            vals = vals * vals
        elif pool_type == "abs":
            vals = jnp.abs(vals)
        return jnp.sum(vals, axis=-1, keepdims=True)

    # Hot path: fully populated blocks, no mask at all.
    @pl.when(blk < num_full)
    def _full_block():
        acc_ref[...] += _row_sum(x_ref[...].astype(jnp.float32))

    # Ragged last block / clamped overflow blocks: zero the padded lanes.
    @pl.when(blk >= num_full)
    def _tail_block():
        x = x_ref[...].astype(jnp.float32)
        col = lax.broadcasted_iota(jnp.int32, x.shape, 1)
        x = jnp.where(blk * s_tile + col < spatial, x, 0.0)
        acc_ref[...] += _row_sum(x)

    @pl.when(k == pl.num_programs(1) - 1)
    def _write():
        o_ref[...] = acc_ref[...][None]          # (1, r_tile, 1)


def _row_sums_streaming(x2d, rows, spatial, pool_type):
    elems = _block_elems(x2d.dtype.itemsize)
    max_s = elems // _SUBLANE
    if spatial <= max_s:
        s_tile = spatial                          # full extent, single step
    else:
        s_tile = _round_up(pl.cdiv(spatial, pl.cdiv(spatial, max_s)), _LANE)
    num_s = pl.cdiv(spatial, s_tile)
    num_full = spatial // s_tile                  # fully populated blocks

    r_cap = max(_SUBLANE, (elems // s_tile) // _SUBLANE * _SUBLANE)
    r_tile, num_r = _split_rows(rows, r_cap)

    # Split-reduction for megacore: one row tile but >= 2 reduction steps ->
    # 2 parallel spatial shards, combined in the XLA epilogue.
    sharded = (num_r == 1) and (num_s >= 2)
    num_shards = 2 if sharded else 1
    steps = pl.cdiv(num_s, num_shards)

    if sharded:
        x_map = lambda p, k: (0, jnp.minimum(p * steps + k, num_s - 1))
        o_map = lambda p, k: (p, 0, 0)
    else:
        x_map = lambda p, k: (p, k)
        o_map = lambda p, k: (0, p, 0)

    kernel = functools.partial(
        _sum_pool_kernel, pool_type=pool_type, s_tile=s_tile, spatial=spatial,
        num_full=num_full, steps_per_shard=steps, sharded=sharded)

    partials = pl.pallas_call(
        kernel,
        out_shape=jax.ShapeDtypeStruct((num_shards, rows, 1), jnp.float32),
        grid=(num_r * num_shards, steps),
        in_specs=[pl.BlockSpec((r_tile, s_tile), x_map)],
        out_specs=pl.BlockSpec((1, r_tile, 1), o_map),
        scratch_shapes=[pltpu.VMEM((r_tile, 1), jnp.float32)],
        compiler_params=pltpu.CompilerParams(
            dimension_semantics=("parallel", "arbitrary"),
            vmem_limit_bytes=_VMEM_LIMIT_BYTES),
    )(x2d)
    return jnp.sum(partials, axis=0)[:, 0]        # (rows,) f32 raw sums


# --------------------------------------------------------------------------
# Small-spatial path (spatial < 128): fold `group` rows into the lane axis and
# compute per-row segment sums with one MXU matmul (block-diagonal ones).
# --------------------------------------------------------------------------
def _folded_pool_kernel(x_ref, o_ref, *, pool_type, group, spatial):
    x = x_ref[...].astype(jnp.float32)            # (r_tile, group*spatial)
    if pool_type == "rms":
        x = x * x
    elif pool_type == "abs":
        x = jnp.abs(x)
    width = group * spatial
    col_seg = lax.broadcasted_iota(jnp.int32, (width, group), 0) // spatial
    seg_id = lax.broadcasted_iota(jnp.int32, (width, group), 1)
    seg_mat = (col_seg == seg_id).astype(jnp.float32)         # (width, group)
    o_ref[...] = jnp.dot(x, seg_mat, preferred_element_type=jnp.float32)


def _row_sums_folded(x2d, rows, spatial, group, pool_type):
    width = group * spatial
    rows_f = rows // group
    elems = _block_elems(x2d.dtype.itemsize)
    r_cap = max(_SUBLANE, (elems // width) // _SUBLANE * _SUBLANE)
    r_tile, num_r = _split_rows(rows_f, r_cap)

    kernel = functools.partial(_folded_pool_kernel, pool_type=pool_type,
                               group=group, spatial=spatial)
    seg_sums = pl.pallas_call(
        kernel,
        out_shape=jax.ShapeDtypeStruct((rows_f, group), jnp.float32),
        grid=(num_r,),
        in_specs=[pl.BlockSpec((r_tile, width), lambda i: (i, 0))],
        out_specs=pl.BlockSpec((r_tile, group), lambda i: (i, 0)),
        compiler_params=pltpu.CompilerParams(
            dimension_semantics=("parallel",),
            vmem_limit_bytes=_VMEM_LIMIT_BYTES),
    )(x2d.reshape(rows_f, width))
    return seg_sums.reshape(rows)                 # (rows,) f32 raw sums


# --------------------------------------------------------------------------
# Public wrapper: PyTorch GlobalPool.forward equivalent.
# --------------------------------------------------------------------------
def global_pool(x: jax.Array, pool_type: str = "mean",
                keep_dim: bool = False) -> jax.Array:
    """Pallas equivalent of GlobalPool.forward for (N,C,H,W) or (N,C,D,H,W)."""
    if x.ndim not in (4, 5):
        raise NotImplementedError("Currently 2D and 3D global pooling supported")
    if pool_type not in ("mean", "rms", "abs"):
        raise ValueError(f"Unsupported pool_type: {pool_type}")

    n, c = x.shape[0], x.shape[1]
    spatial = 1
    for s in x.shape[2:]:
        spatial *= s
    rows = n * c

    x2d = x.reshape(rows, spatial)                # free layout view (NCHW contiguous)

    group = _fold_group(rows, spatial) if spatial < _LANE else 1
    if group > 1:
        row_sums = _row_sums_folded(x2d, rows, spatial, group, pool_type)
    else:
        row_sums = _row_sums_streaming(x2d, rows, spatial, pool_type)

    # Tiny XLA epilogue over (rows,) values: mean = sum/spatial; rms -> **-0.5.
    m = row_sums * (1.0 / spatial)
    if pool_type == "rms":
        m = lax.rsqrt(m)
    out = m.astype(x.dtype)

    if keep_dim:
        return out.reshape((n, c) + (1,) * (x.ndim - 2))
    return out.reshape(n, c)


def _ref_global_pool(x, pool_type, keep_dim):
    dims = tuple(range(2, x.ndim))
    if pool_type == "rms":
        return jnp.mean(x * x, axis=dims, keepdims=keep_dim) ** -0.5
    if pool_type == "abs":
        return jnp.mean(jnp.abs(x), axis=dims, keepdims=keep_dim)
    return jnp.mean(x, axis=dims, keepdims=keep_dim)


if __name__ == "__main__":
    key = jax.random.PRNGKey(0)
    shapes = [
        (2, 4, 16, 16),       # canonical small 4D input (single block)
        (2, 3, 4, 6, 6),      # 5D input (spatial = 144, single block)
        (2, 8, 7, 7),         # spatial < 128 -> lane-folded MXU path
        (4, 2304, 16, 16),    # row-tiled grid, balanced even row split
        (2, 4, 600, 600),     # spatial-sharded reduction + ragged last block
        (1, 2, 880, 880),     # spatial-sharded reduction with clamped overflow block
    ]

    ok = True
    for idx, shape in enumerate(shapes):
        x = jax.random.normal(jax.random.fold_in(key, idx), shape,
                              dtype=jnp.float32)
        for pool_type in ("mean", "rms", "abs"):
            for keep_dim in (False, True):
                out = jax.block_until_ready(
                    global_pool(x, pool_type=pool_type, keep_dim=keep_dim))
                ref = _ref_global_pool(x, pool_type, keep_dim)
                if out.shape != ref.shape or not jnp.allclose(
                        out, ref, atol=1e-5, rtol=1e-4):
                    ok = False

    print("KERNEL_OK" if ok else "KERNEL_MISMATCH")
</pallas_src>

<mosaic_0001>
module attributes {stable_mosaic.version = 11 : i64} {
  func.func @_sum_pool_kernel(%arg0: i32, %arg1: i32, %arg2: memref<8x256xf32, #tpu.memory_space<vmem>>, %arg3: memref<1x8x1xf32, #tpu.memory_space<vmem>>, %arg4: memref<8x1xf32, #tpu.memory_space<vmem>>) attributes {dimension_semantics = [#tpu.dimension_semantics<parallel>, #tpu.dimension_semantics<arbitrary>], iteration_bounds = array<i64: 1, 1>, scalar_prefetch = 0 : i64, scratch_operands = 1 : i64, tpu.core_type = #tpu.core_type<tc>, window_params = [{transform_indices = @transform_0, window_bounds = array<i64: 8, 256>}, {transform_indices = @transform_1, window_bounds = array<i64: 1, 8, 1>}]} {
    %c0_i32 = arith.constant 0 : i32
    %0 = arith.cmpi eq, %arg1, %c0_i32 : i32
    %1 = arith.extui %0 : i1 to i32
    %c0_i32_0 = arith.constant 0 : i32
    %2 = arith.cmpi ne, %1, %c0_i32_0 : i32
    scf.if %2 {
      %cst = arith.constant 0.000000e+00 : f32
      %12 = vector.broadcast %cst : f32 to vector<8x1xf32>
      %c0 = arith.constant 0 : index
      %c0_6 = arith.constant 0 : index
      %13 = vector.load %arg4[%c0, %c0_6] : memref<8x1xf32, #tpu.memory_space<vmem>>, vector<8x1xf32>
      tpu.vector_store %arg4[%c0, %c0_6], %12 {strides = array<i32>} : memref<8x1xf32, #tpu.memory_space<vmem>>, vector<8x1xf32>,
    } else {
    }
    %c1_i32 = arith.constant 1 : i32
    %3 = arith.cmpi slt, %arg1, %c1_i32 : i32
    %4 = arith.extui %3 : i1 to i32
    %c0_i32_1 = arith.constant 0 : i32
    %5 = arith.cmpi ne, %4, %c0_i32_1 : i32
    scf.if %5 {
      %c0 = arith.constant 0 : index
      %c0_6 = arith.constant 0 : index
      %12 = vector.load %arg4[%c0, %c0_6] : memref<8x1xf32, #tpu.memory_space<vmem>>, vector<8x1xf32>
      %c0_7 = arith.constant 0 : index
      %c0_8 = arith.constant 0 : index
      %13 = vector.load %arg2[%c0_7, %c0_8] : memref<8x256xf32, #tpu.memory_space<vmem>>, vector<8x256xf32>
      %cst = arith.constant dense<0.000000e+00> : vector<8xf32>
      %14 = vector.multi_reduction <add>, %13, %cst [1] : vector<8x256xf32> to vector<8xf32>
      %15 = vector.shape_cast %14 : vector<8xf32> to vector<8x1xf32>
      %16 = arith.addf %12, %15 : vector<8x1xf32>
      %c0_9 = arith.constant 0 : index
      %c0_10 = arith.constant 0 : index
      %17 = vector.load %arg4[%c0_9, %c0_10] : memref<8x1xf32, #tpu.memory_space<vmem>>, vector<8x1xf32>
      tpu.vector_store %arg4[%c0_9, %c0_10], %16 {strides = array<i32>} : memref<8x1xf32, #tpu.memory_space<vmem>>, vector<8x1xf32>,
    } else {
    }
    %c1_i32_2 = arith.constant 1 : i32
    %6 = arith.cmpi sge, %arg1, %c1_i32_2 : i32
    %7 = arith.extui %6 : i1 to i32
    %c0_i32_3 = arith.constant 0 : i32
    %8 = arith.cmpi ne, %7, %c0_i32_3 : i32
    scf.if %8 {
      %c0 = arith.constant 0 : index
      %c0_6 = arith.constant 0 : index
      %12 = vector.load %arg2[%c0, %c0_6] : memref<8x256xf32, #tpu.memory_space<vmem>>, vector<8x256xf32>
      %13 = tpu.iota {dimensions = array<i32: 1>} : vector<8x256xi32>
      %c256_i32 = arith.constant 256 : i32
      %14 = arith.muli %arg1, %c256_i32 : i32
      %15 = vector.broadcast %14 : i32 to vector<8x256xi32>
      %16 = arith.addi %15, %13 : vector<8x256xi32>
      %c256_i32_7 = arith.constant 256 : i32
      %17 = vector.broadcast %c256_i32_7 : i32 to vector<8x256xi32>
      %18 = arith.cmpi slt, %16, %17 : vector<8x256xi32>
      %cst = arith.constant 0.000000e+00 : f32
      %19 = vector.broadcast %cst : f32 to vector<8x256xf32>
      %20 = arith.select %18, %12, %19 : vector<8x256xi1>, vector<8x256xf32>
      %c0_8 = arith.constant 0 : index
      %c0_9 = arith.constant 0 : index
      %21 = vector.load %arg4[%c0_8, %c0_9] : memref<8x1xf32, #tpu.memory_space<vmem>>, vector<8x1xf32>
      %cst_10 = arith.constant dense<0.000000e+00> : vector<8xf32>
      %22 = vector.multi_reduction <add>, %20, %cst_10 [1] : vector<8x256xf32> to vector<8xf32>
      %23 = vector.shape_cast %22 : vector<8xf32> to vector<8x1xf32>
      %24 = arith.addf %21, %23 : vector<8x1xf32>
      %c0_11 = arith.constant 0 : index
      %c0_12 = arith.constant 0 : index
      %25 = vector.load %arg4[%c0_11, %c0_12] : memref<8x1xf32, #tpu.memory_space<vmem>>, vector<8x1xf32>
      tpu.vector_store %arg4[%c0_11, %c0_12], %24 {strides = array<i32>} : memref<8x1xf32, #tpu.memory_space<vmem>>, vector<8x1xf32>,
    } else {
    }
    %c0_i32_4 = arith.constant 0 : i32
    %9 = arith.cmpi eq, %arg1, %c0_i32_4 : i32
    %10 = arith.extui %9 : i1 to i32
    %c0_i32_5 = arith.constant 0 : i32
    %11 = arith.cmpi ne, %10, %c0_i32_5 : i32
    scf.if %11 {
      %c0 = arith.constant 0 : index
      %c0_6 = arith.constant 0 : index
      %12 = vector.load %arg4[%c0, %c0_6] : memref<8x1xf32, #tpu.memory_space<vmem>>, vector<8x1xf32>
      %13 = vector.shape_cast %12 : vector<8x1xf32> to vector<1x8x1xf32>
      %c0_7 = arith.constant 0 : index
      %c0_8 = arith.constant 0 : index
      %c0_9 = arith.constant 0 : index
      %14 = vector.load %arg3[%c0_7, %c0_8, %c0_9] : memref<1x8x1xf32, #tpu.memory_space<vmem>>, vector<1x8x1xf32>
      tpu.vector_store %arg3[%c0_7, %c0_8, %c0_9], %13 {strides = array<i32>} : memref<1x8x1xf32, #tpu.memory_space<vmem>>, vector<1x8x1xf32>,
    } else {
    }
    return
  }
  func.func @transform_0(%arg0: i32, %arg1: i32) -> (i32, i32) {
    %c0_i32 = arith.constant 0 : i32
    return %arg0, %arg1 : i32, i32
  }
  func.func @transform_1(%arg0: i32, %arg1: i32) -> (i32, i32, i32) {
    %c0_i32 = arith.constant 0 : i32
    %c0_i32_0 = arith.constant 0 : i32
    %c0_i32_1 = arith.constant 0 : i32
    return %c0_i32, %arg0, %c0_i32_0 : i32, i32, i32
  }
}

</mosaic_0001>

<bundles_post_ra>
// kernel: tpu_custom_call.1
= control target key start
LH: loop header
LB: loop body
LE: loop exit
PB: predicated region body
PF: predicated region fallthrough
CT: control target
= control target key end

     0   :  { %6 = vsyncpa [#allocation4], 0  ;;  %s100_s6 = smov [#allocation3]   ;;  %s127_s0 = inlined_call_operand.hbm [shape: f32[8,256], index: 0, kind: input, shape index: {}]   ;;  %s128_s1 = inlined_call_operand.vmem [shape: f32[1,8,1], index: 1, kind: output, shape index: {}]  }
   0x1   :  { %s13_s7 = sshll.u32 %s100_s6, 4  ;;  %s76_s10 = scalar_lea.hbm %s127_s0, 256  ;;  %s14_s7 = int_to_ptr.vmem [resolvable:$true] %s13_s7 }
   0x2   :  { %p77_p0 = scmp.ne.s32.totalorder %s127_s0, %s76_s10  ;;  %p80_p1 = scmp.lt.u32.totalorder %s76_s10, %s127_s0 }
   0x4   :  { %p82_p2 = pnand %p80_p1, %p77_p0 }
   0x6   :  { %85 = shalt.err (!%p82_p2)
}
   0x7   :  { %s86_s15 = scalar_lea.vmem %s14_s7, 256  ;;  %p91_p4 = scmp.lt.s32.totalorder %s14_s7, %s14_s7 }
   0x8   :  { %p87_p3 = scmp.ne.s32.totalorder %s14_s7, %s86_s15  ;;  %p92_p5 = scmp.lt.s32.totalorder %s86_s15, %s86_s15 }
   0xa   :  { %p93_p6 = por %p92_p5, %p91_p4 }
   0xc   :  { %p94_p7 = pnand %p93_p6, %p87_p3 }
   0xe   :  { %97 = shalt.err (!%p94_p7)
}
   0xf   :  { %16 = dma.hbm_to_vmem [thread:$0]  %s127_s0, 256, %s14_s7, [#allocation4]  }
  0x10   :  { %98 = dma.done.wait [#allocation4], 256  }
  0x11   :  { %99 = vsyncadd [#allocation4], 4294967040  ;;  %vm24_vm0 = vcmask 7168   ;;  %v101_v0 = vmov 0.0   ;;  %v31_v1 = vld [vmem:[#allocation3] sm:$0xff]  ;;  %v32_v2 = vld [vmem:[#allocation3 + $0x8] sm:$0xff] }
  0x12   :  { %25 = vst.msk [vmem:[#allocation2] sm:$0xff] %vm24_vm0, %v101_v0  ;;  %v33_v3 = vadd.f32 %v32_v2, %v31_v1 }
  0x14   :  { %34 = vadd.xlane.f32.xlu0 %v33_v3 }
  0x19   :  { %v30_v4 = vld [vmem:[#allocation2] sm:$0xff] }
  0xa1   :  { %v35_v5 = vpop.xlane.xlu0 %34 }
  0xa2   :  { %v36_v6 = vadd.f32 %v35_v5, %v30_v4 }
  0xa4   :  { %38 = vst.msk [vmem:[#allocation2] sm:$0xff] %vm24_vm0, %v36_v6 }
  0xab   :  { %v66_v7 = vld [vmem:[#allocation2] sm:$0xff] }
  0xac   :  { %68 = vst.msk [vmem:[%s128_s1] sm:$0xff] %vm24_vm0, %v66_v7 }
  0xad   :  { %73 = vsyncpa [#allocation4], 1 }

</bundles_post_ra>
